<compile_context>
chip_gen: v5e
topology: v5e:2x2
jax: 0.10.0
libtpu: 0.0.40
codegen_flags: <defaults>
</compile_context>

<pallas_src>
import functools

import jax
import jax.numpy as jnp
from jax.experimental import pallas as pl
from jax.experimental.pallas import tpu as pltpu


def _round_up(x, m):
    return ((x + m - 1) // m) * m


def _critic_kernel(n_layers, compute_dtype, x_ref, *refs):
    # refs = (W0_T, W1_T, ..., W_{H-2}_T, w_last_row, bias_pack, out)
    out_ref = refs[-1]
    pack_ref = refs[-2]      # (dim, H) f32: cols 0..H-2 biases, col H-1 row0 = b_last
    wlast_ref = refs[-3]     # (1, dim) final-layer weight row
    w_refs = refs[:-3]       # H-1 transposed weights: (out, in)

    # Activations are (prev_dim, tb): batch lives on the lane axis.
    h = x_ref[...]                                            # (n+m, tb)
    for i in range(n_layers - 1):
        acc = jnp.dot(w_refs[i][...], h,
                      preferred_element_type=jnp.float32)     # (dim, tb) f32
        acc = acc + pack_ref[:, i:i + 1]                      # bias lane-broadcast
        h = jnp.maximum(acc, 0.0).astype(compute_dtype)

    # Final (dim -> 1) projection: a rank-1 MXU pass producing a lane-dense
    # (1, tb) output row (4 B per batch row written back to HBM).
    b_last = pack_ref[0:1, n_layers - 1:n_layers]             # (1, 1)
    y = jnp.dot(wlast_ref[...], h,
                preferred_element_type=jnp.float32) + b_last  # (1, tb)
    out_ref[...] = y.astype(out_ref.dtype)


def critic_forward(state, action, params, *, block_b=1024,
                   compute_dtype=jnp.float32):
    """state: (B, n), action: (B, m), params: list of (W (in,out), b (out,)).

    Returns (B, 1) critic values; the entire MLP runs in one Pallas kernel.
    """
    B, n = state.shape
    _, m = action.shape
    H = len(params)
    assert H >= 2, "Critic is defined with at least an input and an output layer"
    dim = params[0][0].shape[1]

    # Batch lives on the lane axis -> tiles are multiples of 128 lanes.
    b128 = _round_up(B, 128)
    tb = min(_round_up(block_b, 128), b128)
    if b128 >= 2 * 128:                      # guarantee >=2 grid steps (v7x megacore)
        tb = min(tb, _round_up(-(-b128 // 2), 128))
    b_pad = _round_up(B, tb)
    grid = (b_pad // tb,)

    # Single packed, transposed input (n+m, b_pad): the concat + transpose of a
    # (B, n+m) array is negligible host/XLA work and removes one DMA stream.
    xT = jnp.concatenate([state, action], axis=1).T
    xT = jnp.pad(xT, ((0, 0), (0, b_pad - B))).astype(compute_dtype)

    # Transposed weights (out, in) so h_new = W @ h keeps batch on lanes.
    w_flat = [w.T.astype(compute_dtype) for (w, _) in params[:-1]]
    w_last_row = params[-1][0].T.astype(compute_dtype)        # (1, dim)

    # Fold all biases + final bias into one small VMEM-resident pack.
    pack = jnp.zeros((dim, H), jnp.float32)
    for i, (_, b) in enumerate(params[:-1]):
        pack = pack.at[:, i].set(b.astype(jnp.float32))
    pack = pack.at[0, H - 1].set(params[-1][1].reshape(()).astype(jnp.float32))

    kernel = functools.partial(_critic_kernel, H, compute_dtype)

    in_specs = [pl.BlockSpec((n + m, tb), lambda i: (0, i))]
    # Weights / pack: full-array blocks with constant index maps -> fetched
    # once and kept VMEM-resident across batch-grid steps.
    for a in (*w_flat, w_last_row, pack):
        in_specs.append(pl.BlockSpec(a.shape, lambda i: (0, 0)))

    itemsize = jnp.dtype(compute_dtype).itemsize
    flops = int(2 * b_pad * (dim * (n + m) + dim * dim * max(H - 2, 0) + dim))
    bytes_accessed = int(
        b_pad * (n + m) * itemsize + b_pad * 4
        + sum(int(a.size) * a.dtype.itemsize for a in (*w_flat, w_last_row))
        + int(pack.size) * 4)

    out = pl.pallas_call(
        kernel,
        grid=grid,
        out_shape=jax.ShapeDtypeStruct((1, b_pad), jnp.float32),
        in_specs=in_specs,
        out_specs=pl.BlockSpec((1, tb), lambda i: (0, i)),
        compiler_params=pltpu.CompilerParams(
            dimension_semantics=("parallel",)),
        cost_estimate=pl.CostEstimate(flops=flops, transcendentals=0,
                                      bytes_accessed=bytes_accessed),
    )(xT, *w_flat, w_last_row, pack)

    return out[0, :B].reshape(B, 1)


def init_critic_params(key, n, m, dim, H):
    """Deterministic synthetic init matching nn.Linear shapes.

    Layer 0: (n+m) -> dim ; layers 1..H-2: dim -> dim ; layer H-1: dim -> 1.
    Weights stored as (in, out) (reference convention: h @ W + b).
    """
    sizes = [(n + m, dim)] + [(dim, dim)] * (H - 2) + [(dim, 1)]
    params = []
    for (fan_in, fan_out) in sizes:
        key, kw, kb = jax.random.split(key, 3)
        bound = 1.0 / jnp.sqrt(fan_in)
        w = jax.random.uniform(kw, (fan_in, fan_out), jnp.float32, -bound, bound)
        b = jax.random.uniform(kb, (fan_out,), jnp.float32, -bound, bound)
        params.append((w, b))
    return params


def critic_reference(state, action, params):
    """Pure-JAX reference for correctness check."""
    h = jnp.concatenate([state, action], axis=1)
    for i, (w, b) in enumerate(params):
        h = h @ w + b
        if i < len(params) - 1:
            h = jnp.maximum(h, 0.0)
    return h


if __name__ == "__main__":
    # Shapes consistent with the module: n=6 state dims, m=2 action dims,
    # hidden dim=32, H=3 layers, batch=4.
    n, m, dim, H, B = 6, 2, 32, 3, 4

    key = jax.random.PRNGKey(0)
    key, ks, ka, kp = jax.random.split(key, 4)
    state = jax.random.normal(ks, (B, n), jnp.float32)
    action = jax.random.normal(ka, (B, m), jnp.float32)
    params = init_critic_params(kp, n, m, dim, H)

    out = jax.block_until_ready(critic_forward(state, action, params))
    ref = critic_reference(state, action, params)
    assert out.shape == (B, 1), out.shape
    assert jnp.allclose(out, ref, atol=1e-5, rtol=1e-5), (out, ref)

    # Second check: multiple batch tiles + padding + >=2 grid steps (v7x path).
    B2 = 300
    key, ks2, ka2 = jax.random.split(key, 3)
    state2 = jax.random.normal(ks2, (B2, n), jnp.float32)
    action2 = jax.random.normal(ka2, (B2, m), jnp.float32)
    out2 = jax.block_until_ready(critic_forward(state2, action2, params))
    ref2 = critic_reference(state2, action2, params)
    assert out2.shape == (B2, 1), out2.shape
    assert jnp.allclose(out2, ref2, atol=1e-5, rtol=1e-5), (out2, ref2)

    # Third check: bf16 MXU path (native v6e/v7x datapath), loose tolerance.
    out3 = jax.block_until_ready(
        critic_forward(state2, action2, params, compute_dtype=jnp.bfloat16))
    assert out3.shape == (B2, 1), out3.shape
    assert jnp.allclose(out3, ref2, atol=1e-1, rtol=1e-1)

    print("KERNEL_OK")
</pallas_src>

<mosaic_0001>
module attributes {stable_mosaic.version = 11 : i64} {
  func.func @_critic_kernel(%arg0: i32, %arg1: memref<8x128xf32, #tpu.memory_space<vmem>>, %arg2: memref<32x8xf32, #tpu.memory_space<vmem>>, %arg3: memref<32x32xf32, #tpu.memory_space<vmem>>, %arg4: memref<1x32xf32, #tpu.memory_space<vmem>>, %arg5: memref<32x3xf32, #tpu.memory_space<vmem>>, %arg6: memref<1x128xf32, #tpu.memory_space<vmem>>) attributes {dimension_semantics = [#tpu.dimension_semantics<parallel>], iteration_bounds = array<i64: 1>, scalar_prefetch = 0 : i64, scratch_operands = 0 : i64, tpu.core_type = #tpu.core_type<tc>, window_params = [{transform_indices = @transform_0, window_bounds = array<i64: 8, 128>}, {pipeline_mode = #tpu.pipeline_mode<synchronous>, transform_indices = @transform_1, window_bounds = array<i64: 32, 8>}, {pipeline_mode = #tpu.pipeline_mode<synchronous>, transform_indices = @transform_2, window_bounds = array<i64: 32, 32>}, {pipeline_mode = #tpu.pipeline_mode<synchronous>, transform_indices = @transform_3, window_bounds = array<i64: 1, 32>}, {pipeline_mode = #tpu.pipeline_mode<synchronous>, transform_indices = @transform_4, window_bounds = array<i64: 32, 3>}, {transform_indices = @transform_5, window_bounds = array<i64: 1, 128>}]} {
    %c0 = arith.constant 0 : index
    %c0_0 = arith.constant 0 : index
    %0 = vector.load %arg1[%c0, %c0_0] : memref<8x128xf32, #tpu.memory_space<vmem>>, vector<8x128xf32>
    %c0_1 = arith.constant 0 : index
    %c0_2 = arith.constant 0 : index
    %1 = vector.load %arg2[%c0_1, %c0_2] : memref<32x8xf32, #tpu.memory_space<vmem>>, vector<32x8xf32>
    %cst = arith.constant dense<0.000000e+00> : vector<32x128xf32>
    %2 = tpu.matmul %1, %0, %cst {dimension_numbers = #tpu.dot_dimension_numbers<[1], [0], [0], [1], [0, 0, 1, 1], [], []>} : vector<32x8xf32>, vector<8x128xf32>, vector<32x128xf32> -> vector<32x128xf32>
    %c0_3 = arith.constant 0 : index
    %c0_4 = arith.constant 0 : index
    %3 = vector.load %arg5[%c0_3, %c0_4] : memref<32x3xf32, #tpu.memory_space<vmem>>, vector<32x1xf32>
    %4 = vector.broadcast %3 : vector<32x1xf32> to vector<32x128xf32>
    %5 = arith.addf %2, %4 : vector<32x128xf32>
    %cst_5 = arith.constant 0.000000e+00 : f32
    %6 = vector.broadcast %cst_5 : f32 to vector<32x128xf32>
    %7 = arith.maximumf %5, %6 : vector<32x128xf32>
    %c0_6 = arith.constant 0 : index
    %c0_7 = arith.constant 0 : index
    %8 = vector.load %arg3[%c0_6, %c0_7] : memref<32x32xf32, #tpu.memory_space<vmem>>, vector<32x32xf32>
    %cst_8 = arith.constant dense<0.000000e+00> : vector<32x128xf32>
    %9 = tpu.matmul %8, %7, %cst_8 {dimension_numbers = #tpu.dot_dimension_numbers<[1], [0], [0], [1], [0, 0, 1, 1], [], []>} : vector<32x32xf32>, vector<32x128xf32>, vector<32x128xf32> -> vector<32x128xf32>
    %c0_9 = arith.constant 0 : index
    %c1 = arith.constant 1 : index
    %10 = vector.load %arg5[%c0_9, %c1] : memref<32x3xf32, #tpu.memory_space<vmem>>, vector<32x1xf32>
    %11 = vector.broadcast %10 : vector<32x1xf32> to vector<32x128xf32>
    %12 = arith.addf %9, %11 : vector<32x128xf32>
    %cst_10 = arith.constant 0.000000e+00 : f32
    %13 = vector.broadcast %cst_10 : f32 to vector<32x128xf32>
    %14 = arith.maximumf %12, %13 : vector<32x128xf32>
    %c0_11 = arith.constant 0 : index
    %c2 = arith.constant 2 : index
    %15 = vector.load %arg5[%c0_11, %c2] : memref<32x3xf32, #tpu.memory_space<vmem>>, vector<1x1xf32>
    %c0_12 = arith.constant 0 : index
    %c0_13 = arith.constant 0 : index
    %16 = vector.load %arg4[%c0_12, %c0_13] : memref<1x32xf32, #tpu.memory_space<vmem>>, vector<1x32xf32>
    %cst_14 = arith.constant dense<0.000000e+00> : vector<1x128xf32>
    %17 = tpu.matmul %16, %14, %cst_14 {dimension_numbers = #tpu.dot_dimension_numbers<[1], [0], [0], [1], [0, 0, 1, 1], [], []>} : vector<1x32xf32>, vector<32x128xf32>, vector<1x128xf32> -> vector<1x128xf32>
    %18 = vector.broadcast %15 : vector<1x1xf32> to vector<1x128xf32>
    %19 = arith.addf %17, %18 : vector<1x128xf32>
    %c0_15 = arith.constant 0 : index
    %c0_16 = arith.constant 0 : index
    %20 = vector.load %arg6[%c0_15, %c0_16] : memref<1x128xf32, #tpu.memory_space<vmem>>, vector<1x128xf32>
    tpu.vector_store %arg6[%c0_15, %c0_16], %19 {strides = array<i32>} : memref<1x128xf32, #tpu.memory_space<vmem>>, vector<1x128xf32>,
    return
  }
  func.func @transform_0(%arg0: i32) -> (i32, i32) {
    %c0_i32 = arith.constant 0 : i32
    %c0_i32_0 = arith.constant 0 : i32
    return %c0_i32, %arg0 : i32, i32
  }
  func.func @transform_1(%arg0: i32) -> (i32, i32) {
    %c0_i32 = arith.constant 0 : i32
    %c0_i32_0 = arith.constant 0 : i32
    %c0_i32_1 = arith.constant 0 : i32
    return %c0_i32, %c0_i32_0 : i32, i32
  }
  func.func @transform_2(%arg0: i32) -> (i32, i32) {
    %c0_i32 = arith.constant 0 : i32
    %c0_i32_0 = arith.constant 0 : i32
    %c0_i32_1 = arith.constant 0 : i32
    return %c0_i32, %c0_i32_0 : i32, i32
  }
  func.func @transform_3(%arg0: i32) -> (i32, i32) {
    %c0_i32 = arith.constant 0 : i32
    %c0_i32_0 = arith.constant 0 : i32
    %c0_i32_1 = arith.constant 0 : i32
    return %c0_i32, %c0_i32_0 : i32, i32
  }
  func.func @transform_4(%arg0: i32) -> (i32, i32) {
    %c0_i32 = arith.constant 0 : i32
    %c0_i32_0 = arith.constant 0 : i32
    %c0_i32_1 = arith.constant 0 : i32
    return %c0_i32, %c0_i32_0 : i32, i32
  }
  func.func @transform_5(%arg0: i32) -> (i32, i32) {
    %c0_i32 = arith.constant 0 : i32
    %c0_i32_0 = arith.constant 0 : i32
    return %c0_i32, %arg0 : i32, i32
  }
}

</mosaic_0001>

<bundles_post_ra>
// kernel: tpu_custom_call.1
= control target key start
LH: loop header
LB: loop body
LE: loop exit
PB: predicated region body
PF: predicated region fallthrough
CT: control target
= control target key end

     0   :  { %vm50_vm0 = vcmask 64512   ;;  %v260_v4 = vmov 0   ;;  %s351_s0 = inlined_call_operand.vmem [shape: f32[8,128], index: 0, kind: input, shape index: {}]   ;;  %s352_s1 = inlined_call_operand.vmem [shape: f32[32,8], index: 1, kind: input, shape index: {}]   ;;  %s353_s2 = inlined_call_operand.vmem [shape: f32[32,32], index: 2, kind: input, shape index: {}]   ;;  %s354_s3 = inlined_call_operand.vmem [shape: f32[1,32], index: 3, kind: input, shape index: {}]   ;;  %s355_s4 = inlined_call_operand.vmem [shape: f32[32,3], index: 4, kind: input, shape index: {}]   ;;  %s356_s5 = inlined_call_operand.hbm [shape: f32[1,128], index: 5, kind: output, shape index: {}]  }
   0x1   :  { %v21_v0 = vld [vmem:[%s351_s0] sm:$0xff]  ;;  %v25_v2 = vld [vmem:[%s352_s1 + $0x18] sm:$0xff]  ;;  %v27_v3 = vld [vmem:[%s355_s4 + $0x8] sm:$0xff]  ;;  %228 = vset.pattern.permute.xlu1 %v260_v4 }
   0x2   :  { %v22_v1 = vld [vmem:[%s352_s1] sm:$0xff]  ;;  %78 = vmatpush.msra.mxu0 %v21_v0  ;;  %218 = vmatpush.msra.mxu2 %v21_v0  ;;  %v29_v5 = vld [vmem:[%s355_s4 + $0x18] sm:$0xff] }
   0x3   :  { %209 = vmatmul.msk.f32.vlgmr.msra.gmra.mxu0 %vm50_vm0, %v22_v1  ;;  %212 = vmatmul.msk.f32.vlgmr.msra.gmra.mxu2 %vm50_vm0, %v25_v2 }
   0x4   :  { %37 = vperm.xlu1 %228, %v27_v3  }
   0x5   :  { %10 = vsyncpa [#allocation3], 0  ;;  %227 = vset.pattern.permute.xlu0 %v260_v4  ;;  %v23_v6 = vld [vmem:[%s352_s1 + $0x8] sm:$0xff]  ;;  %v26_v7 = vld [vmem:[%s355_s4] sm:$0xff]  ;;  %v261_v11 = vmov 1   ;;  %vm116_vm1 = vcmask 261120  }
   0x6   :  { %47 = vperm.xlu0 %227, %v29_v5   ;;  %v28_v8 = vld [vmem:[%s355_s4 + $0x10] sm:$0xff]  ;;  %229 = vset.pattern.permute.xlu2 %v261_v11  ;;  %v96_v28 = vld [vmem:[%s353_s2] sm:$0xff]  ;;  %v99_v29 = vld [vmem:[%s353_s2 + $0x18] sm:$0xff]  ;;  %v262_v32 = vmov 2   ;;  %s263_s19 = smov [#allocation2]   ;;  %s200_s23 = sshll.u32 %s356_s5, 4  ;;  %s201_s23 = int_to_ptr.hbm [resolvable:$true] %s200_s23 }
   0x7   :  { %v24_v9 = vld [vmem:[%s352_s1 + $0x10] sm:$0xff]  ;;  %113 = vperm.xlu2 %229, %v29_v5   ;;  %v97_v30 = vld [vmem:[%s353_s2 + $0x8] sm:$0xff]  ;;  %v162_v31 = vld [vmem:[%s355_s4] sm:$0x1]  ;;  %s198_s20 = sshll.u32 %s263_s19, 4  ;;  %s199_s20 = int_to_ptr.vmem [resolvable:$true] %s198_s20 }
   0x8   :  { %v98_v27 = vld [vmem:[%s353_s2 + $0x10] sm:$0xff]  ;;  %v163_v49 = vld [vmem:[%s354_s3] sm:$0x1] }
   0xb   :  { %210 = vmatmul.msk.f32.gmra.mxu0 %vm50_vm0, %v23_v6 }
   0xc   :  { %32 = vperm.xlu1 %228, %v26_v7  }
   0xe   :  { %42 = vperm.xlu0 %227, %v28_v8  }
   0xf   :  { %109 = vperm.xlu2 %229, %v28_v8  }
  0x13   :  { %211 = vmatmul.msk.f32.gmra.mxu0 %vm50_vm0, %v24_v9 }
  0x14   :  { %231 = vset.pattern.permute.xlu1 %v261_v11 }
  0x15   :  { %101 = vperm.xlu1 %231, %v26_v7  }
  0x16   :  { %230 = vset.pattern.permute.xlu0 %v261_v11 }
  0x17   :  { %105 = vperm.xlu0 %230, %v27_v3   ;;  %232 = vset.pattern.permute.xlu2 %v262_v32 }
  0x18   :  { %166 = vperm.xlu2 %232, %v162_v31  }
  0x1f   :  { %233 = vset.pattern.permute.xlu0 %v262_v32 }
  0x61   :  { %v114_v33 = vpop.permute.xlu2 %113 }
  0x69   :  { %v110_v36 = vpop.permute.xlu2 %109 }
  0x72   :  { %v167_v50 = vpop.permute.xlu2 %166 }
  0x76   :  { %v38_v12 = vpop.permute.xlu1 %37 }
  0x78   :  { %v48_v13 = vpop.permute.xlu0 %47 }
  0x7e   :  { %v33_v18 = vpop.permute.xlu1 %32 }
  0x80   :  { %v80_v10 = vpop.f32.mrf.mxu0  ;;  %v43_v19 = vpop.permute.xlu0 %42 }
  0x81   :  { %v81_v23 = vadd.f32 %v80_v10, %v33_v18 }
  0x83   :  { %v92_v26 = vmax.f32 %v81_v23, 0.0 }
  0x86   :  { %v89_v14 = vpop.f32.mrf.mxu2 }
  0x87   :  { %v90_v16 = vadd.f32 %v89_v14, %v48_v13  ;;  %v102_v43 = vpop.permute.xlu1 %101 }
  0x88   :  { %v83_v15 = vpop.f32.mrf.mxu0 }
  0x89   :  { %v95_v17 = vmax.f32 %v90_v16, 0.0  ;;  %v84_v21 = vadd.f32 %v83_v15, %v38_v12  ;;  %v106_v37 = vpop.permute.xlu0 %105 }
  0x8b   :  { %141 = vmatpush.msra.mxu1 %v95_v17  ;;  %219 = vmatpush.msra.mxu3 %v95_v17  ;;  %v93_v25 = vmax.f32 %v84_v21, 0.0 }
  0x90   :  { %v86_v20 = vpop.f32.mrf.mxu0 }
  0x91   :  { %v87_v22 = vadd.f32 %v86_v20, %v43_v19 }
  0x93   :  { %v94_v24 = vmax.f32 %v87_v22, 0.0 }
  0x95   :  { %142 = vmatpush.msra.mxu1 %v94_v24  ;;  %220 = vmatpush.msra.mxu3 %v94_v24 }
  0x97   :  { %143 = vmatpush.msra.mxu1 %v93_v25  ;;  %221 = vmatpush.msra.mxu3 %v93_v25 }
  0x99   :  { %144 = vmatpush.msra.mxu1 %v92_v26  ;;  %222 = vmatpush.msra.mxu3 %v92_v26 }
  0x9a   :  { %215 = vmatmul.msk.f32.vlgmr.msra.gmra.mxu3 %vm116_vm1, %v98_v27  ;;  %213 = vmatmul.msk.f32.vlgmr.msra.gmra.mxu1 %vm116_vm1, %v96_v28 }
  0xa2   :  { %216 = vmatmul.msk.f32.gmra.mxu3 %vm116_vm1, %v99_v29  ;;  %214 = vmatmul.msk.f32.gmra.mxu1 %vm116_vm1, %v97_v30 }
 0x117   :  { %v146_v34 = vpop.f32.mrf.mxu1 }
 0x118   :  { %v147_v46 = vadd.f32 %v146_v34, %v102_v43 }
 0x11a   :  { %v158_v48 = vmax.f32 %v147_v46, 0.0 }
 0x11d   :  { %v152_v35 = vpop.f32.mrf.mxu3 }
 0x11e   :  { %v153_v40 = vadd.f32 %v152_v35, %v110_v36 }
 0x11f   :  { %v149_v38 = vpop.f32.mrf.mxu1 }
 0x120   :  { %v150_v42 = vadd.f32 %v149_v38, %v106_v37  ;;  %v160_v45 = vmax.f32 %v153_v40, 0.0 }
 0x122   :  { %v159_v47 = vmax.f32 %v150_v42, 0.0 }
 0x125   :  { %v155_v39 = vpop.f32.mrf.mxu3 }
 0x126   :  { %v156_v41 = vadd.f32 %v155_v39, %v114_v33 }
 0x128   :  { %v161_v44 = vmax.f32 %v156_v41, 0.0 }
 0x12a   :  { %184 = vmatpush.msrb.mxu2 %v161_v44 }
 0x12c   :  { %185 = vmatpush.msrb.mxu2 %v160_v45 }
 0x12e   :  { %186 = vmatpush.msrb.mxu2 %v159_v47 }
 0x130   :  { %187 = vmatpush.msrb.mxu2 %v158_v48 }
 0x131   :  { %217 = vmatmul.msk.f32.vlgmr.msrb.gmra.mxu2 %vm116_vm1, %v163_v49 }
 0x1b4   :  { %v189_v51 = vpop.f32.mrf.mxu2 }
 0x1b5   :  { %v190_v52 = vadd.f32 %v189_v51, %v167_v50 }
 0x1b7   :  { %192 = vst [vmem:[#allocation2] sm:$0x1] %v190_v52 }
 0x1b8   :  { %203 = dma.vmem_to_hbm [thread:$0]  %s199_s20, 16, %s201_s23, [#allocation3]  }
 0x1b9   :  { %258 = dma.done.wait [#allocation3], 16  }
 0x1ba   :  { %259 = vsyncadd [#allocation3], 4294967280 }
 0x1bb   :  { %208 = vsyncpa [#allocation3], 1 }

</bundles_post_ra>
